<compile_context>
chip_gen: v6e
topology: v6e:2x2x1
jax: 0.10.0
libtpu: 0.0.40
codegen_flags: <defaults>
</compile_context>

<pallas_src>
import jax
import jax.numpy as jnp
from jax.experimental import pallas as pl
from jax.experimental.pallas import tpu as pltpu


def _add_pe_kernel(x_ref, pe_ref, o_ref):
    # Broadcasted elementwise add. pe block is (1, TS, 1) on the 3-D path or
    # (1, TN) on the flattened path; jnp broadcasting handles both.
    o_ref[...] = x_ref[...] + pe_ref[...]


def _pick_tile(n, target, align):
    """Largest multiple of `align` that divides n and is <= max(target, align).
    Falls back to n (full extent, always a legal block dim) if n % align != 0."""
    if n % align != 0:
        return n
    t = min(max(target, align), n)
    t -= t % align
    while t > align and n % t != 0:
        t -= align
    return t


_TINY_BYTES = 128 * 1024        # below this, XLA fusion beats pallas_call overhead
_BLOCK_BYTE_BUDGET = 1 << 20    # ~1 MiB x-block; x+out double-buffered + tiny pe
                                # stays far under scoped VMEM on all chips (incl. v7x)


def incremental_positional_encoder(x, pe, *, force_pallas=False, donate_x=False):
    """x: (B, S, D), pe: (1, L, D) with L >= S. Returns x + pe[:, :S]."""
    B, S, D = x.shape
    L = pe.shape[1]
    if S > L:
        raise ValueError(f"sequence length {S} exceeds max_seq_length {L}")

    itemsize = jnp.dtype(x.dtype).itemsize
    # pe is constant along d_model -> keep only the (1, S, 1) column, in x.dtype
    # (avoids silent f32 promotion when x is bf16 and shrinks pe's VMEM/HBM traffic).
    pe_col = pe[:1, :S, :1].astype(x.dtype)

    # Tiny problems: pallas_call fixed overhead dwarfs the add; let XLA fuse it.
    if not force_pallas and x.size * itemsize < _TINY_BYTES:
        return x + pe_col

    sublane = {1: 32, 2: 16}.get(itemsize, 8)
    io_alias = {0: 0} if donate_x else {}

    if D % 128 == 0:
        # ---- 3-D path: d_model is already lane-dense. -----------------------
        rows_target = max(sublane, _BLOCK_BYTE_BUDGET // (D * itemsize))
        ts = _pick_tile(S, min(rows_target, 1024), sublane)
        grid = (B, S // ts)
        return pl.pallas_call(
            _add_pe_kernel,
            out_shape=jax.ShapeDtypeStruct((B, S, D), x.dtype),
            grid_spec=pltpu.PrefetchScalarGridSpec(
                num_scalar_prefetch=0,
                grid=grid,
                in_specs=[
                    pl.BlockSpec((1, ts, D), lambda b, s: (b, s, 0)),
                    pl.BlockSpec((1, ts, 1), lambda b, s: (0, s, 0)),  # pe column, bcast over D
                ],
                out_specs=pl.BlockSpec((1, ts, D), lambda b, s: (b, s, 0)),
            ),
            compiler_params=pltpu.CompilerParams(
                dimension_semantics=("parallel", "parallel")),
            input_output_aliases=io_alias,
        )(x, pe_col)

    # ---- Flattened path: make the kernel's last dim lane-dense. -------------
    # (S, D) -> S*D so stores are unmasked full-lane vst when S*D % 128 == 0.
    # pe becomes a (1, S*D) row (each pe[s] repeated D times), broadcast over batch.
    n = S * D
    x_flat = x.reshape(B, n)
    pe_flat = jnp.repeat(pe_col[0, :, 0], D).reshape(1, n)
    tb = _pick_tile(B, 8, sublane)
    cols_target = max(128, _BLOCK_BYTE_BUDGET // (tb * itemsize))
    tn = _pick_tile(n, cols_target, 128)
    grid = (B // tb, n // tn)
    out = pl.pallas_call(
        _add_pe_kernel,
        out_shape=jax.ShapeDtypeStruct((B, n), x.dtype),
        grid_spec=pltpu.PrefetchScalarGridSpec(
            num_scalar_prefetch=0,
            grid=grid,
            in_specs=[
                pl.BlockSpec((tb, tn), lambda i, j: (i, j)),
                pl.BlockSpec((1, tn), lambda i, j: (0, j)),   # pe row, bcast over batch tile
            ],
            out_specs=pl.BlockSpec((tb, tn), lambda i, j: (i, j)),
        ),
        compiler_params=pltpu.CompilerParams(
            dimension_semantics=("parallel", "parallel")),
        input_output_aliases=io_alias,
    )(x_flat, pe_flat)
    return out.reshape(B, S, D)


def make_pe(d_model, max_seq_length=11, dtype=jnp.float32):
    # Deterministic "buffer" construction, matching the PyTorch __init__.
    pe = jnp.linspace(0.0, 1.0, max_seq_length, dtype=dtype)[:, None]   # (L, 1)
    pe = jnp.tile(pe, (1, d_model))                                     # (L, D)
    return pe[None]                                                     # (1, L, D)


if __name__ == "__main__":
    B, S, D = 2, 8, 32
    max_seq_length = 11

    key = jax.random.PRNGKey(0)
    x = jax.random.normal(key, (B, S, D), dtype=jnp.float32)
    pe = make_pe(D, max_seq_length)

    # Reference (same semantics as the PyTorch forward).
    ref = x + pe[:, :S]

    # force_pallas=True so the Pallas kernel is exercised even at demo sizes
    # (the wrapper would otherwise let XLA fuse such a tiny add).
    out = incremental_positional_encoder(x, pe, force_pallas=True)
    out = jax.block_until_ready(out)

    assert out.shape == (B, S, D)
    assert out.dtype == x.dtype
    assert jnp.allclose(out, ref, atol=1e-6), "mismatch vs reference"

    print("KERNEL_OK")
</pallas_src>

<mosaic_0001>
module attributes {stable_mosaic.version = 11 : i64} {
  func.func @_add_pe_kernel(%arg0: i32, %arg1: i32, %arg2: memref<2x256xf32, #tpu.memory_space<vmem>>, %arg3: memref<1x256xf32, #tpu.memory_space<vmem>>, %arg4: memref<2x256xf32, #tpu.memory_space<vmem>>) attributes {dimension_semantics = [#tpu.dimension_semantics<parallel>, #tpu.dimension_semantics<parallel>], iteration_bounds = array<i64: 1, 1>, scalar_prefetch = 0 : i64, scratch_operands = 0 : i64, tpu.core_type = #tpu.core_type<tc>, window_params = [{transform_indices = @transform_0, window_bounds = array<i64: 2, 256>}, {transform_indices = @transform_1, window_bounds = array<i64: 1, 256>}, {transform_indices = @transform_2, window_bounds = array<i64: 2, 256>}]} {
    %c0 = arith.constant 0 : index
    %c0_0 = arith.constant 0 : index
    %0 = vector.load %arg2[%c0, %c0_0] : memref<2x256xf32, #tpu.memory_space<vmem>>, vector<2x256xf32>
    %c0_1 = arith.constant 0 : index
    %c0_2 = arith.constant 0 : index
    %1 = vector.load %arg3[%c0_1, %c0_2] : memref<1x256xf32, #tpu.memory_space<vmem>>, vector<1x256xf32>
    %2 = vector.broadcast %1 : vector<1x256xf32> to vector<2x256xf32>
    %3 = arith.addf %0, %2 : vector<2x256xf32>
    %c0_3 = arith.constant 0 : index
    %c0_4 = arith.constant 0 : index
    %4 = vector.load %arg4[%c0_3, %c0_4] : memref<2x256xf32, #tpu.memory_space<vmem>>, vector<2x256xf32>
    tpu.vector_store %arg4[%c0_3, %c0_4], %3 {strides = array<i32>} : memref<2x256xf32, #tpu.memory_space<vmem>>, vector<2x256xf32>,
    return
  }
  func.func @transform_0(%arg0: i32, %arg1: i32) -> (i32, i32) {
    %c0_i32 = arith.constant 0 : i32
    return %arg0, %arg1 : i32, i32
  }
  func.func @transform_1(%arg0: i32, %arg1: i32) -> (i32, i32) {
    %c0_i32 = arith.constant 0 : i32
    %c0_i32_0 = arith.constant 0 : i32
    return %c0_i32, %arg1 : i32, i32
  }
  func.func @transform_2(%arg0: i32, %arg1: i32) -> (i32, i32) {
    %c0_i32 = arith.constant 0 : i32
    return %arg0, %arg1 : i32, i32
  }
}

</mosaic_0001>

<bundles_post_ra>
// kernel: tpu_custom_call.1
= control target key start
LH: loop header
LB: loop body
LE: loop exit
PB: predicated region body
PF: predicated region fallthrough
CT: control target
= control target key end

     0   :  { %7 = vsyncpa [#allocation3], 0  ;;  %s172_s0 = inlined_call_operand.hbm [shape: f32[2,256], index: 0, kind: input, shape index: {}]   ;;  %s173_s1 = inlined_call_operand.hbm [shape: f32[1,256], index: 1, kind: input, shape index: {}]   ;;  %s174_s2 = inlined_call_operand.hbm [shape: f32[2,256], index: 2, kind: output, shape index: {}]  }
   0x1   :  { %8 = vsyncpa [#allocation6], 0 }
   0x2   :  { %9 = vsyncpa [#allocation4], 0  ;;  %s144_s9 = smov [#allocation2]   ;;  %s145_s11 = smov [#allocation5]  }
   0x3   :  { %s16_s10 = sshll.u32 %s144_s9, 4  ;;  %s26_s12 = sshll.u32 %s145_s11, 4  ;;  %s17_s10 = int_to_ptr.vmem [resolvable:$true] %s16_s10  ;;  %s27_s12 = int_to_ptr.vmem [resolvable:$true] %s26_s12 }
   0x4   :  { %s86_s13 = scalar_lea.vmem %s17_s10, 64  ;;  %p91_p1 = scmp.lt.s32.totalorder %s17_s10, %s17_s10 }
   0x5   :  { %p87_p0 = scmp.ne.s32.totalorder %s17_s10, %s86_s13  ;;  %p92_p2 = scmp.lt.s32.totalorder %s86_s13, %s86_s13 }
   0x7   :  { %p93_p3 = por %p92_p2, %p91_p1 }
   0x9   :  { %p94_p4 = pnand %p93_p3, %p87_p0 }
   0xb   :  { %97 = shalt.err (!%p94_p4)
}
   0xc   :  { %19 = dma.hbm_to_vmem [thread:$0]  %s172_s0, 64, %s17_s10, [#allocation3]  }
   0xd   :  { %s106_s16 = scalar_lea.vmem %s27_s12, 32  ;;  %p111_p6 = scmp.lt.s32.totalorder %s27_s12, %s27_s12 }
   0xe   :  { %p107_p5 = scmp.ne.s32.totalorder %s27_s12, %s106_s16  ;;  %p112_p7 = scmp.lt.s32.totalorder %s106_s16, %s106_s16 }
  0x10   :  { %p113_p8 = por %p112_p7, %p111_p6 }
  0x12   :  { %p114_p9 = pnand %p113_p8, %p107_p5 }
  0x14   :  { %117 = shalt.err (!%p114_p9)
}
  0x15   :  { %29 = dma.hbm_to_vmem [thread:$0]  %s173_s1, 32, %s27_s12, [#allocation6]  }
  0x16   :  { %138 = dma.done.wait [#allocation3], 64  }
  0x17   :  { %139 = vsyncadd [#allocation3], 4294967232 }
  0x18   :  { %140 = dma.done.wait [#allocation6], 32  }
  0x19   :  { %141 = vsyncadd [#allocation6], 4294967264  ;;  %v39_v0 = vlaneseq  ;;  %v146_v1 = vmov 1983009808   ;;  %v37_v7 = vld [vmem:[#allocation5] sm:$0x3] }
  0x1a   :  { %v49_v2 = vunpack.c.l.s4 %v146_v1  ;;  %v36_v12 = vld [vmem:[#allocation2] sm:$0xf]  ;;  %s147_s0 = smov [#allocation7]  }
  0x1b   :  { %v40_v3 = vshrl.u32 %v39_v0, 7  ;;  %s64_s19 = sshll.u32 %s147_s0, 4  ;;  %s65_s19 = int_to_ptr.vmem [resolvable:$true] %s64_s19 }
  0x1c   :  { %v50_v6 = vunpack.c.0.s8 %v49_v2  ;;  %s118_s1 = scalar_lea.vmem %s65_s19, 64  ;;  %p123_p11 = scmp.lt.s32.totalorder %s65_s19, %s65_s19 }
  0x1d   :  { %v41_v4 = vsub.s32 0, %v40_v3  ;;  %v45_v5 = vsub.s32 1, %v40_v3  ;;  %p119_p10 = scmp.ne.s32.totalorder %s65_s19, %s118_s1  ;;  %p124_p12 = scmp.lt.s32.totalorder %s118_s1, %s118_s1 }
  0x1e   :  { %v53_v10 = vsub.s32 %v50_v6, %v40_v3 }
  0x1f   :  { %v42_v8 = vrot.slane %v37_v7, %v41_v4  ;;  %v46_v9 = vrot.slane %v37_v7, %v45_v5  ;;  %p125_p13 = por %p124_p12, %p123_p11 }
  0x21   :  { %v47_v11 = vcombine.low %v42_v8, %v46_v9  ;;  %p126_p0 = pnand %p125_p13, %p119_p10 }
  0x23   :  { %v54_v13 = vrot.slane %v47_v11, %v53_v10 }
  0x25   :  { %v56_v14 = vadd.f32 %v54_v13, %v36_v12 }
  0x27   :  { %57 = vst [vmem:[#allocation7] sm:$0xf] %v56_v14 }
  0x28   :  { %129 = shalt.err (!%p126_p0)
}
  0x29   :  { %67 = dma.vmem_to_hbm [thread:$0]  %s65_s19, 64, %s174_s2, [#allocation4]  }
  0x2a   :  { %142 = dma.done.wait [#allocation4], 64  }
  0x2b   :  { %143 = vsyncadd [#allocation4], 4294967232 }
  0x2c   :  { %71 = vsyncpa [#allocation3], 1 }
  0x2d   :  { %72 = vsyncpa [#allocation6], 1 }
  0x2e   :  { %73 = vsyncpa [#allocation4], 1 }

</bundles_post_ra>
